<compile_context>
chip_gen: v7x
topology: tpu7x:2x2x1
jax: 0.10.0
libtpu: 0.0.40
codegen_flags: <defaults>
</compile_context>

<pallas_src>
import numpy as np
import jax
import jax.numpy as jnp
from jax.experimental import pallas as pl
from jax.experimental.pallas import tpu as pltpu


# ----------------------------------------------------------------------------
# Config mirroring the `h` hyper-parameter object (small, self-contained).
# ----------------------------------------------------------------------------
class HParams:
    upsample_rates = (2, 2)
    upsample_kernel_sizes = (4, 4)


# ----------------------------------------------------------------------------
# Deterministic parameter initialization (shapes dictated by __init__).
# ----------------------------------------------------------------------------
def init_generator_params(h, key):
    # TODO(synk): conv_pre / ups / conv_post are dead code in the reference mock forward;
    # a real HiFi-GAN forward would need conv1d / transposed-conv Pallas kernels instead
    # of the randn path implemented below.
    params = {}
    k0, k1, k2 = jax.random.split(key, 3)
    params["conv_pre_w"] = jax.random.normal(k0, (512, 80, 7), jnp.float32) * 0.02
    params["conv_pre_b"] = jnp.zeros((512,), jnp.float32)
    ups = []
    uk = jax.random.split(k1, len(h.upsample_rates))
    for i, (u_r, k) in enumerate(zip(h.upsample_rates, h.upsample_kernel_sizes)):
        c_in = 512 if i == 0 else 512 // (2 ** i)
        c_out = 512 // (2 ** (i + 1))
        w = jax.random.normal(uk[i], (c_in, c_out, k), jnp.float32) * 0.02  # (Cin, Cout, K)
        b = jnp.zeros((c_out,), jnp.float32)
        ups.append((w, b))
    params["ups"] = ups
    c_last = 512 // (2 ** len(h.upsample_rates))
    params["conv_post_w"] = jax.random.normal(k2, (1, c_last, 7), jnp.float32) * 0.02
    params["conv_post_b"] = jnp.zeros((1,), jnp.float32)
    return params


# ----------------------------------------------------------------------------
# Kernel: random bits -> uniforms -> full Box-Muller pair -> N(0,1) tile.
# ----------------------------------------------------------------------------
_INV_2_23 = np.float32(1.0 / 8388608.0)   # 2**-23
_TWO_PI = np.float32(2.0 * np.pi)


def randn_boxmuller_kernel(b1_ref, b2_ref, o_ref):
    # 23 low bits -> uniform floats.  u1 in (0, 1] so log(u1) is finite; u2 in [0, 1).
    m1 = jnp.bitwise_and(b1_ref[...], jnp.int32(0x7FFFFF))
    m2 = jnp.bitwise_and(b2_ref[...], jnp.int32(0x7FFFFF))
    u1 = (m1.astype(jnp.float32) + 1.0) * _INV_2_23
    u2 = m2.astype(jnp.float32) * _INV_2_23
    r = jnp.sqrt(-2.0 * jnp.log(u1))          # shared by both halves (EUP)
    theta = _TWO_PI * u2
    half = o_ref.shape[-1] // 2               # 128-aligned for tiled shapes
    o_ref[:, :, :half] = r * jnp.cos(theta)
    o_ref[:, :, half:] = r * jnp.sin(theta)


# ----------------------------------------------------------------------------
# Wrapper: mirrors Generator.forward(x) -> (B, 1, seq_len * prod(upsample_rates))
# ----------------------------------------------------------------------------
def generator_forward(x, h, key):
    B = x.shape[0]
    seq_len = x.shape[2]
    total_upsampling = int(np.prod(h.upsample_rates))
    out_len = seq_len * total_upsampling      # always even (upsample rates >= 2)

    # Lane-dense tile along L: multiple of 256 (each Box-Muller half 128-aligned),
    # capped at 4096 lanes.  Tiny outputs use a single exact-fit tile.
    if out_len < 256:
        tile_l = out_len
    else:
        tile_l = min(4096, (out_len // 256) * 256)
    n_tiles = pl.cdiv(out_len, tile_l)
    half_tile = tile_l // 2

    # One pair of uniforms per two output samples; drawn outside the kernel so the
    # kernel is portable (TPU hardware PRNG has no interpret/CPU lowering).
    kb1, kb2 = jax.random.split(key)
    bits_shape = (B, 1, n_tiles * half_tile)
    bits1 = jax.lax.bitcast_convert_type(
        jax.random.bits(kb1, bits_shape, dtype=jnp.uint32), jnp.int32)
    bits2 = jax.lax.bitcast_convert_type(
        jax.random.bits(kb2, bits_shape, dtype=jnp.uint32), jnp.int32)

    n_elems = B * out_len
    out = pl.pallas_call(
        randn_boxmuller_kernel,
        out_shape=jax.ShapeDtypeStruct((B, 1, out_len), jnp.float32),
        grid=(n_tiles,),
        in_specs=[
            pl.BlockSpec((B, 1, half_tile), lambda i: (0, 0, i)),
            pl.BlockSpec((B, 1, half_tile), lambda i: (0, 0, i)),
        ],
        out_specs=pl.BlockSpec((B, 1, tile_l), lambda i: (0, 0, i)),
        compiler_params=pltpu.CompilerParams(dimension_semantics=("parallel",)),
        cost_estimate=pl.CostEstimate(
            flops=8 * n_elems,
            transcendentals=2 * n_elems,
            bytes_accessed=8 * n_elems,
        ),
    )(bits1, bits2)
    return out


# ----------------------------------------------------------------------------
# Demo
# ----------------------------------------------------------------------------
if __name__ == "__main__":
    h = HParams()
    root = jax.random.PRNGKey(0)
    k_param, k_x, k_noise = jax.random.split(root, 3)

    # Parameters per __init__ (deterministic; unused by the mock forward).
    params = init_generator_params(h, k_param)

    # Input: (B=2, C=80 mel channels, L=8 frames) — PyTorch NCL layout.
    x = jax.random.normal(k_x, (2, 80, 8), dtype=jnp.float32)

    y = generator_forward(x, h, k_noise)
    y = jax.block_until_ready(y)

    expected_shape = (x.shape[0], 1, x.shape[2] * int(np.prod(h.upsample_rates)))
    assert y.shape == expected_shape, (y.shape, expected_shape)
    assert y.dtype == jnp.float32
    assert bool(jnp.all(jnp.isfinite(y)))
    std = float(jnp.std(y))
    assert 0.3 < std < 3.0, std  # loose sanity check: standard-normal-ish

    print("KERNEL_OK")
</pallas_src>

<mosaic_0001>
module attributes {stable_mosaic.version = 11 : i64} {
  func.func @randn_boxmuller_kernel(%arg0: i32, %arg1: memref<2x1x16xi32, #tpu.memory_space<vmem>>, %arg2: memref<2x1x16xi32, #tpu.memory_space<vmem>>, %arg3: memref<2x1x32xf32, #tpu.memory_space<vmem>>) attributes {dimension_semantics = [#tpu.dimension_semantics<parallel>], iteration_bounds = array<i64: 1>, scalar_prefetch = 0 : i64, scratch_operands = 0 : i64, tpu.core_type = #tpu.core_type<tc>, window_params = [{transform_indices = @transform_0, window_bounds = array<i64: 2, 1, 16>}, {transform_indices = @transform_1, window_bounds = array<i64: 2, 1, 16>}, {transform_indices = @transform_2, window_bounds = array<i64: 2, 1, 32>}]} {
    %c0 = arith.constant 0 : index
    %c0_0 = arith.constant 0 : index
    %c0_1 = arith.constant 0 : index
    %0 = vector.load %arg1[%c0, %c0_0, %c0_1] : memref<2x1x16xi32, #tpu.memory_space<vmem>>, vector<2x1x16xi32>
    %c8388607_i32 = arith.constant 8388607 : i32
    %1 = vector.broadcast %c8388607_i32 : i32 to vector<2x1x16xi32>
    %2 = arith.andi %0, %1 : vector<2x1x16xi32>
    %c0_2 = arith.constant 0 : index
    %c0_3 = arith.constant 0 : index
    %c0_4 = arith.constant 0 : index
    %3 = vector.load %arg2[%c0_2, %c0_3, %c0_4] : memref<2x1x16xi32, #tpu.memory_space<vmem>>, vector<2x1x16xi32>
    %c8388607_i32_5 = arith.constant 8388607 : i32
    %4 = vector.broadcast %c8388607_i32_5 : i32 to vector<2x1x16xi32>
    %5 = arith.andi %3, %4 : vector<2x1x16xi32>
    %6 = arith.sitofp %2 : vector<2x1x16xi32> to vector<2x1x16xf32>
    %cst = arith.constant 1.000000e+00 : f32
    %7 = vector.broadcast %cst : f32 to vector<2x1x16xf32>
    %8 = arith.addf %6, %7 : vector<2x1x16xf32>
    %cst_6 = arith.constant 1.1920929E-7 : f32
    %9 = vector.broadcast %cst_6 : f32 to vector<2x1x16xf32>
    %10 = arith.mulf %8, %9 : vector<2x1x16xf32>
    %11 = arith.sitofp %5 : vector<2x1x16xi32> to vector<2x1x16xf32>
    %cst_7 = arith.constant 1.1920929E-7 : f32
    %12 = vector.broadcast %cst_7 : f32 to vector<2x1x16xf32>
    %13 = arith.mulf %11, %12 : vector<2x1x16xf32>
    %14 = math.log %10 : vector<2x1x16xf32>
    %cst_8 = arith.constant -2.000000e+00 : f32
    %15 = vector.broadcast %cst_8 : f32 to vector<2x1x16xf32>
    %16 = arith.mulf %15, %14 : vector<2x1x16xf32>
    %17 = math.sqrt %16 : vector<2x1x16xf32>
    %cst_9 = arith.constant 6.28318548 : f32
    %18 = vector.broadcast %cst_9 : f32 to vector<2x1x16xf32>
    %19 = arith.mulf %18, %13 : vector<2x1x16xf32>
    %20 = math.cos %19 : vector<2x1x16xf32>
    %21 = arith.mulf %17, %20 : vector<2x1x16xf32>
    %c0_10 = arith.constant 0 : index
    %c0_11 = arith.constant 0 : index
    %c0_12 = arith.constant 0 : index
    %22 = vector.load %arg3[%c0_10, %c0_11, %c0_12] : memref<2x1x32xf32, #tpu.memory_space<vmem>>, vector<2x1x16xf32>
    tpu.vector_store %arg3[%c0_10, %c0_11, %c0_12], %21 {strides = array<i32>} : memref<2x1x32xf32, #tpu.memory_space<vmem>>, vector<2x1x16xf32>,
    %23 = math.sin %19 : vector<2x1x16xf32>
    %24 = arith.mulf %17, %23 : vector<2x1x16xf32>
    %c0_13 = arith.constant 0 : index
    %c0_14 = arith.constant 0 : index
    %c16 = arith.constant 16 : index
    %25 = vector.load %arg3[%c0_13, %c0_14, %c16] : memref<2x1x32xf32, #tpu.memory_space<vmem>>, vector<2x1x16xf32>
    tpu.vector_store %arg3[%c0_13, %c0_14, %c16], %24 {strides = array<i32>} : memref<2x1x32xf32, #tpu.memory_space<vmem>>, vector<2x1x16xf32>,
    return
  }
  func.func @transform_0(%arg0: i32) -> (i32, i32, i32) {
    %c0_i32 = arith.constant 0 : i32
    %c0_i32_0 = arith.constant 0 : i32
    %c0_i32_1 = arith.constant 0 : i32
    return %c0_i32, %c0_i32_0, %arg0 : i32, i32, i32
  }
  func.func @transform_1(%arg0: i32) -> (i32, i32, i32) {
    %c0_i32 = arith.constant 0 : i32
    %c0_i32_0 = arith.constant 0 : i32
    %c0_i32_1 = arith.constant 0 : i32
    return %c0_i32, %c0_i32_0, %arg0 : i32, i32, i32
  }
  func.func @transform_2(%arg0: i32) -> (i32, i32, i32) {
    %c0_i32 = arith.constant 0 : i32
    %c0_i32_0 = arith.constant 0 : i32
    %c0_i32_1 = arith.constant 0 : i32
    return %c0_i32, %c0_i32_0, %arg0 : i32, i32, i32
  }
}

</mosaic_0001>

<bundles_post_ra>
// kernel: tpu_custom_call.1
= control target key start
LH: loop header
LB: loop body
LE: loop exit
PB: predicated region body
PF: predicated region fallthrough
CT: control target
= control target key end

     0   :  { %7 = vsyncpa [#allocation3], 0  ;;  %s796_s0 = inlined_call_operand.hbm [shape: s32[2,1,16], index: 0, kind: input, shape index: {}]   ;;  %s797_s1 = inlined_call_operand.vmem [shape: s32[2,1,16], index: 1, kind: input, shape index: {}]   ;;  %s798_s2 = inlined_call_operand.hbm [shape: f32[2,1,32], index: 2, kind: output, shape index: {}]  }
   0x1   :  { %8 = vsyncpa [#allocation4], 0  ;;  %s621_s9 = smov [#allocation2]   ;;  %s573_s13 = scalar_lea.hbm %s796_s0, 32 }
   0x2   :  { %s14_s10 = sshll.u32 %s621_s9, 4  ;;  %p574_p0 = scmp.ne.s32.totalorder %s796_s0, %s573_s13  ;;  %s15_s10 = int_to_ptr.vmem [resolvable:$true] %s14_s10 }
   0x3   :  { %p577_p1 = scmp.lt.u32.totalorder %s573_s13, %s796_s0 }
   0x5   :  { %p579_p2 = pnand %p577_p1, %p574_p0 }
   0x7   :  { %582 = shalt.err (!%p579_p2)
}
   0x8   :  { %s583_s18 = scalar_lea.vmem %s15_s10, 32  ;;  %p588_p4 = scmp.lt.s32.totalorder %s15_s10, %s15_s10 }
   0x9   :  { %p584_p3 = scmp.ne.s32.totalorder %s15_s10, %s583_s18  ;;  %p589_p5 = scmp.lt.s32.totalorder %s583_s18, %s583_s18 }
   0xb   :  { %p590_p6 = por %p589_p5, %p588_p4 }
   0xd   :  { %p591_p7 = pnand %p590_p6, %p584_p3 }
   0xf   :  { %594 = shalt.err (!%p591_p7)
}
  0x10   :  { %s622_s19 = smov 16   ;;  %s623_s20 = smov 1  }
  0x11   :  { %20 = dma.hbm_to_vmem [thread:$0]  %s796_s0, 32, %s15_s10, [#allocation3], %s622_s19, %s622_s19, %s623_s20  }
  0x12   :  { %617 = dma.done.wait [#allocation3], 32  }
  0x13   :  { %618 = vsyncadd [#allocation3], 4294967264  ;;  %v30_v0 = vld [vmem:[%s797_s1] sm:$0x1]  ;;  %v31_v2 = vld [vmem:[%s797_s1 + $0x1] sm:$0x1] }
  0x14   :  { %v32_v1 = vand.u32 8388607, %v30_v0  ;;  %v33_v4 = vand.u32 8388607, %v31_v2  ;;  %v624_v23 = vmov 683565275  }
  0x15   :  { %v625_v25 = vmov 2475754826   ;;  %v626_v27 = vmov 2131351028   ;;  %v26_v31 = vld [vmem:[#allocation2] sm:$0x1] }
  0x16   :  { %v40_v3 = vcvt.s32.f32 %v32_v1  ;;  %v41_v6 = vcvt.s32.f32 %v33_v4  ;;  %v627_v34 = vmov 2102212464   ;;  %v628_v38 = vmov 920167782   ;;  %s630_s0 = smov [#allocation5]  }
  0x17   :  { %v28_v44 = vand.u32 8388607, %v26_v31  ;;  %v629_v45 = vmov 1326507024   ;;  %s511_s1 = sshll.u32 %s630_s0, 4  ;;  %s512_s1 = int_to_ptr.vmem [resolvable:$true] %s511_s1 }
  0x18   :  { %v42_v5 = vmul.f32 1.1920929e-07, %v40_v3  ;;  %v43_v8 = vmul.f32 1.1920929e-07, %v41_v6  ;;  %s595_s27 = scalar_lea.vmem %s512_s1, 32  ;;  %p600_p9 = scmp.lt.s32.totalorder %s512_s1, %s512_s1 }
  0x19   :  { %v34_v60 = vcvt.s32.f32 %v28_v44  ;;  %p596_p8 = scmp.ne.s32.totalorder %s512_s1, %s595_s27  ;;  %p601_p10 = scmp.lt.s32.totalorder %s595_s27, %s595_s27 }
  0x1a   :  { %v667_v7 = vmul.f32 6.2831855, %v42_v5  ;;  %v670_v10 = vmul.f32 6.2831855, %v43_v8 }
  0x1b   :  { %p602_p11 = por %p601_p10, %p600_p9 }
  0x1c   :  { %v69_v9 = vand.u32 2139095040, %v667_v7  ;;  %v172_v12 = vand.u32 2139095040, %v670_v10  ;;  %v66_v14 = vand.u32 2147483647, %v667_v7  ;;  %v169_v59 = vand.u32 2147483647, %v670_v10 }
  0x1d   :  { %vm68_vm13 = vcmp.lt.s32.totalorder %v667_v7, 0  ;;  %p603_p12 = pnand %p602_p11, %p596_p8 }
  0x1e   :  { %v70_v11 = vshrl.u32 %v69_v9, 23  ;;  %v173_v15 = vshrl.u32 %v172_v12, 23  ;;  %v73_v17 = vand.u32 8388607, %v66_v14  ;;  %v176_v6 = vand.u32 8388607, %v169_v59 }
  0x1f   :  { %v36_v12 = vadd.f32 1.0, %v34_v60  ;;  %vm67_vm14 = vcmp.le.f32.partialorder %v66_v14, 0.7853982 }
  0x20   :  { %v523_v13 = vadd.s32 4294967169, %v70_v11  ;;  %v527_v19 = vadd.s32 4294967169, %v173_v15  ;;  %v74_v29 = vor.u32 8388608, %v73_v17 }
  0x22   :  { %v76_v16 = vadd.s32 1, %v523_v13  ;;  %v179_v30 = vadd.s32 1, %v527_v19  ;;  %v114_v49 = vshll.u32 %v74_v29, 8 }
  0x24   :  { %vm77_vm0 = vcmp.gt.s32.totalorder %v76_v16, 0  ;;  %vm180_vm3 = vcmp.gt.s32.totalorder %v179_v30, 0 }
  0x25   :  { %v78_v18 = vsel %vm77_vm0, %v76_v16, 0  ;;  %v181_v56 = vsel %vm180_vm3, %v179_v30, 0 }
  0x26   :  { %v80_v20 = vand.u32 31, %v78_v18  ;;  %v79_v21 = vshrl.u32 %v78_v18, 5  ;;  %v183_v63 = vand.u32 31, %v181_v56  ;;  %v182_v15 = vshrl.u32 %v181_v56, 5 }
  0x28   :  { %v81_v22 = vsub.s32 32, %v80_v20  ;;  %v83_v24 = vshll.u32 %v624_v23, %v80_v20  ;;  %v86_v26 = vshll.u32 %v625_v25, %v80_v20  ;;  %v89_v28 = vshll.u32 %v626_v27, %v80_v20 }
  0x29   :  { %v92_v36 = vshll.u32 %v627_v34, %v80_v20  ;;  %v95_v39 = vshll.u32 %v628_v38, %v80_v20  ;;  %vm98_vm1 = vcmp.lt.s32.totalorder %v79_v21, 1  ;;  %vm101_vm2 = vcmp.lt.s32.totalorder %v79_v21, 4 }
  0x2a   :  { %v84_v32 = vshrl.u32 %v625_v25, %v81_v22  ;;  %v87_v33 = vshrl.u32 %v626_v27, %v81_v22  ;;  %v90_v35 = vshrl.u32 %v627_v34, %v81_v22  ;;  %v82_v37 = vshrl.u32 %v624_v23, %v81_v22 }
  0x2b   :  { %v93_v43 = vshrl.u32 %v628_v38, %v81_v22  ;;  %v96_v46 = vshrl.u32 %v629_v45, %v81_v22  ;;  %vm100_vm4 = vcmp.lt.s32.totalorder %v79_v21, 3  ;;  %vm99_vm5 = vcmp.lt.s32.totalorder %v79_v21, 2 }
  0x2c   :  { %v85_v40 = vor.u32 %v84_v32, %v83_v24  ;;  %v88_v41 = vor.u32 %v87_v33, %v86_v26  ;;  %v91_v42 = vor.u32 %v90_v35, %v89_v28  ;;  %v184_v8 = vsub.s32 32, %v183_v63 }
  0x2d   :  { %v94_v47 = vor.u32 %v93_v43, %v92_v36  ;;  %v97_v50 = vor.u32 %v96_v46, %v95_v39  ;;  %v186_v9 = vshll.u32 %v624_v23, %v183_v63  ;;  %v189_v11 = vshll.u32 %v625_v25, %v183_v63 }
  0x2e   :  { %v103_v48 = vsel %vm101_vm2, %v91_v42, 2102212464  ;;  %v102_v51 = vsel %vm98_vm1, %v82_v37, %v85_v40  ;;  %v106_v52 = vsel %vm98_vm1, %v85_v40, %v88_v41  ;;  %v110_v55 = vsel %vm98_vm1, %v88_v41, %v91_v42 }
  0x2f   :  { %v104_v53 = vsel %vm100_vm4, %v88_v41, %v103_v48  ;;  %v107_v54 = vsel %vm101_vm2, %v94_v47, 920167782  ;;  %v111_v58 = vsel %vm101_vm2, %v97_v50, 1326507024  ;;  %v187_v17 = vshrl.u32 %v625_v25, %v184_v8 }
  0x30   :  { %v108_v57 = vsel %vm100_vm4, %v91_v42, %v107_v54  ;;  %v112_v62 = vsel %vm100_vm4, %v94_v47, %v111_v58  ;;  %v105_v0 = vsel %vm99_vm5, %v102_v51, %v104_v53  ;;  %v190_v18 = vshrl.u32 %v626_v27, %v184_v8  ;;  %v27_v42 = vld [vmem:[#allocation2 + $0x1] sm:$0x1] }
  0x31   :  { %v109_v61 = vsel %vm99_vm5, %v106_v52, %v108_v57  ;;  %v113_v1 = vsel %vm99_vm5, %v110_v55, %v112_v62  ;;  %v121_v13 = vmul.u32 %v114_v49, %v105_v0  ;;  %v192_v19 = vshll.u32 %v626_v27, %v183_v63 }
  0x32   :  { %v685_v2 = vmul.u32.u64.low %v114_v49, %v109_v61  ;;  %v686_v3 = vmul.u32.u64.high %v114_v49, %v109_v61, %v685_v2  ;;  %v689_v4 = vmul.u32.u64.low %v114_v49, %v113_v1  ;;  %v690_v5 = vmul.u32.u64.high %v114_v49, %v113_v1, %v689_v4 }
  0x33   :  { %v193_v20 = vshrl.u32 %v627_v34, %v184_v8  ;;  %v195_v21 = vshll.u32 %v627_v34, %v183_v63  ;;  %v198_v22 = vshll.u32 %v628_v38, %v183_v63  ;;  %v177_v26 = vor.u32 8388608, %v176_v6 }
  0x34   :  { %v124_v16 = vadd.s32 1, %v686_v3  ;;  %vm123_vm6 = vc.u32 %v690_v5, %v685_v2  ;;  %v188_v28 = vor.u32 %v187_v17, %v186_v9  ;;  %v191_v29 = vor.u32 %v190_v18, %v189_v11 }
  0x35   :  { %v185_v31 = vshrl.u32 %v624_v23, %v184_v8  ;;  %v196_v32 = vshrl.u32 %v628_v38, %v184_v8  ;;  %v199_v33 = vshrl.u32 %v629_v45, %v184_v8  ;;  %v194_v35 = vor.u32 %v193_v20, %v192_v19 }
  0x36   :  { %v125_v24 = vsel %vm123_vm6, %v124_v16, %v686_v3  ;;  %vm201_vm7 = vcmp.lt.s32.totalorder %v182_v15, 1  ;;  %vm204_vm8 = vcmp.lt.s32.totalorder %v182_v15, 4  ;;  %vm203_vm9 = vcmp.lt.s32.totalorder %v182_v15, 3 }
  0x37   :  { %v126_v30 = vadd.s32 %v125_v24, %v121_v13  ;;  %v197_v27 = vor.u32 %v196_v32, %v195_v21  ;;  %v200_v36 = vor.u32 %v199_v33, %v198_v22  ;;  %vm202_vm10 = vcmp.lt.s32.totalorder %v182_v15, 2 }
  0x38   :  { %v206_v34 = vsel %vm204_vm8, %v194_v35, 2102212464  ;;  %v209_v37 = vsel %vm201_vm7, %v188_v28, %v191_v29  ;;  %v217_v39 = vshll.u32 %v177_v26, 8  ;;  %v38_v40 = vmul.f32 1.1920929e-07, %v36_v12 }
  0x39   :  { %v127_v25 = vadd.s32 536870912, %v126_v30  ;;  %v205_v23 = vsel %vm201_vm7, %v185_v31, %v188_v28  ;;  %v210_v38 = vsel %vm204_vm8, %v197_v27, 920167782  ;;  %v207_v43 = vsel %vm203_vm9, %v191_v29, %v206_v34 }
  0x3a   :  { %v211_v44 = vsel %vm203_vm9, %v194_v35, %v210_v38  ;;  %v213_v45 = vsel %vm201_vm7, %v191_v29, %v194_v35  ;;  %v214_v46 = vsel %vm204_vm8, %v200_v36, 1326507024  ;;  %v29_v49 = vand.u32 8388607, %v27_v42 }
  0x3b   :  { %v128_v41 = vshrl.u32 %v127_v25, 30  ;;  %v212_v48 = vsel %vm202_vm10, %v209_v37, %v211_v44  ;;  %v215_v50 = vsel %vm203_vm9, %v197_v27, %v214_v46  ;;  %557 = vlog2.f32 %v38_v40 }
  0x3c   :  { %v710_v51 = vmul.u32.u64.low %v217_v39, %v212_v48  ;;  %v711_v52 = vmul.u32.u64.high %v217_v39, %v212_v48, %v710_v51  ;;  %v208_v54 = vsel %vm202_vm10, %v205_v23, %v207_v43  ;;  %v216_v55 = vsel %vm202_vm10, %v213_v45, %v215_v50 }
  0x3d   :  { %v129_v47 = vshll.u32 %v128_v41, 30  ;;  %v715_v56 = vmul.u32.u64.low %v217_v39, %v216_v55  ;;  %v716_v57 = vmul.u32.u64.high %v217_v39, %v216_v55, %v715_v56  ;;  %v224_v60 = vmul.u32 %v217_v39, %v208_v54 }
  0x3e   :  { %v227_v61 = vadd.s32 1, %v711_v52  ;;  %v35_v63 = vcvt.s32.f32 %v29_v49  ;;  %v122_v11 = vadd.s32 %v685_v2, %v690_v5  ;;  %v152_v31 = vsub.s32 4, %v128_v41 }
  0x3f   :  { %v130_v53 = vsub.s32 %v126_v30, %v129_v47  ;;  %vm226_vm11 = vc.u32 %v716_v57, %v710_v51  ;;  %v225_v37 = vadd.s32 %v710_v51, %v716_v57  ;;  %v489_v51 = vlaneseq }
  0x40   :  { %v228_v1 = vsel %vm226_vm11, %v227_v61, %v711_v52  ;;  %v37_v6 = vadd.f32 1.0, %v35_v63  ;;  %v153_v27 = vsel %vm68_vm13, %v152_v31, %v128_v41  ;;  %vm743_vm1 = vcmp.le.f32.partialorder %v169_v59, 0.7853982 }
  0x41   :  { %v132_v58 = vsub.s32 0, %v130_v53  ;;  %v229_v3 = vadd.s32 %v228_v1, %v224_v60  ;;  %v155_v42 = vsel %vm67_vm14, 0, %v153_v27  ;;  %v739_v61 = vshrl.u32 %v489_v51, 7 }
  0x42   :  { %v39_v18 = vmul.f32 1.1920929e-07, %v37_v6  ;;  %v370_v48 = vadd.s32 3, %v155_v42  ;;  %v159_v56 = vand.u32 3, %v155_v42  ;;  %vm171_vm2 = vcmp.lt.s32.totalorder %v670_v10, 0 }
  0x43   :  { %v524_v62 = vmin.u32 %v132_v58, %v130_v53  ;;  %v230_v8 = vadd.s32 536870912, %v229_v3  ;;  %vm158_vm8 = vweird.f32 %v667_v7  ;;  %vm274_vm11 = vcmask 122880  }
  0x44   :  { %559 = vlog2.f32 %v39_v18  ;;  %v371_v57 = vand.u32 3, %v370_v48  ;;  %vm161_vm4 = vcmp.eq.s32.totalorder %v159_v56, 0  ;;  %vm164_vm5 = vcmp.eq.s32.totalorder %v159_v56, 2 }
  0x45   :  { %v134_v0 = vclz %v524_v62  ;;  %v558_v9 = vpop.eup %557  ;;  %v723_v13 = vshrl.u32 %v230_v8, 30  ;;  %vm160_vm9 = vcmp.lt.s32.totalorder %v159_v56, 2 }
  0x46   :  { %v45_v19 = vmul.f32 0.6931472, %v558_v9  ;;  %vm376_vm6 = vcmp.eq.s32.totalorder %v371_v57, 2  ;;  %vm373_vm7 = vcmp.eq.s32.totalorder %v371_v57, 0  ;;  %vm372_vm10 = vcmp.lt.s32.totalorder %v371_v57, 2 }
  0x47   :  { %v525_v4 = vadd.s32 4294967294, %v134_v0  ;;  %v232_v20 = vshll.u32 %v723_v13, 30  ;;  %v255_v60 = vsub.s32 4, %v723_v13 }
  0x48   :  { %v726_v29 = vmul.f32 -2.0, %v45_v19 }
  0x49   :  { %vm526_vm12 = vcmp.lt.s32.totalorder %v525_v4, 0  ;;  %v233_v24 = vsub.s32 %v229_v3, %v232_v20  ;;  %v256_v8 = vsel %vm171_vm2, %v255_v60, %v723_v13 }
  0x4a   :  { %v137_v12 = vsel %vm526_vm12, 0, %v525_v4  ;;  %561 = vrsqrt.f32 %v726_v29  ;;  %vm52_vm0 = vcmp.eq.f32.partialorder %v726_v29, inf  ;;  %vm54_vm3 = vcmp.eq.f32.partialorder %v726_v29, 0.0 }
  0x4b   :  { %v138_v15 = vsub.s32 32, %v137_v12  ;;  %v139_v16 = vshll.u32 %v130_v53, %v137_v12  ;;  %v142_v17 = vsub.s32 4294967266, %v137_v12  ;;  %v235_v2 = vsub.s32 0, %v233_v24 }
  0x4c   :  { %v55_v63 = vand.u32 2147483648, %v726_v29  ;;  %v258_v19 = vsel %vm743_vm1, 0, %v256_v8 }
  0x4d   :  { %v140_v21 = vshrl.u32 %v122_v11, %v138_v15  ;;  %v143_v22 = vadd.s32 127, %v142_v17  ;;  %v528_v32 = vmin.u32 %v235_v2, %v233_v24  ;;  %v474_v2 = vadd.s32 3, %v258_v19 }
  0x4e   :  { %v560_v39 = vpop.eup %559  ;;  %v262_v31 = vand.u32 3, %v258_v19 }
  0x4f   :  { %v141_v26 = vor.u32 %v140_v21, %v139_v16  ;;  %v144_v28 = vshll.u32 %v143_v22, 23  ;;  %v237_v35 = vclz %v528_v32  ;;  %v47_v41 = vmul.f32 0.6931472, %v560_v39 }
  0x50   :  { %v491_v22 = vsub.s32 0, %v739_v61  ;;  %v475_v32 = vand.u32 3, %v474_v2 }
  0x51   :  { %v145_v5 = vor.u32 4788187, %v144_v28  ;;  %v148_v30 = vcvt.s32.f32 %v141_v26  ;;  %v529_v36 = vadd.s32 4294967294, %v237_v35  ;;  %v734_v52 = vmul.f32 -2.0, %v47_v41 }
  0x53   :  { %v146_v33 = vand.u32 2147483647, %v145_v5  ;;  %vm530_vm15 = vcmp.lt.s32.totalorder %v529_v36, 0  ;;  %vm59_vm12 = vcmp.eq.f32.partialorder %v734_v52, inf }
  0x54   :  { %v240_v23 = vsel %vm530_vm15, 0, %v529_v36  ;;  %v562_v14 = vpop.eup %561  ;;  %vm480_vm15 = vcmp.eq.s32.totalorder %v475_v32, 2 }
  0x55   :  { %v149_v25 = vmul.f32 %v148_v30, %v146_v33  ;;  %v241_v43 = vsub.s32 32, %v240_v23  ;;  %v242_v44 = vshll.u32 %v233_v24, %v240_v23  ;;  %v245_v45 = vsub.s32 4294967266, %v240_v23 }
  0x56   :  { %v51_v55 = vmul.f32 %v562_v14, %v726_v29 }
  0x57   :  { %v150_v34 = vxor.u32 2147483648, %v149_v25  ;;  %v243_v46 = vshrl.u32 %v225_v37, %v241_v43  ;;  %v246_v47 = vadd.s32 127, %v245_v45 }
  0x58   :  { %v53_v3 = vsel %vm52_vm0, %v726_v29, %v51_v55  ;;  %vm264_vm0 = vcmp.eq.s32.totalorder %v262_v31, 0 }
  0x59   :  { %v151_v40 = vsel %vm68_vm13, %v150_v34, %v149_v25  ;;  %v244_v49 = vor.u32 %v243_v46, %v242_v44  ;;  %v247_v50 = vshll.u32 %v246_v47, 23  ;;  %v56_v11 = vsel %vm54_vm3, %v55_v63, %v53_v3 }
  0x5a   :  { %v154_v38 = vsel %vm67_vm14, %v667_v7, %v151_v40  ;;  %vm61_vm13 = vcmp.eq.f32.partialorder %v734_v52, 0.0  ;;  %v62_v7 = vand.u32 2147483648, %v734_v52  ;;  %vm267_vm14 = vcmp.eq.s32.totalorder %v262_v31, 2 }
  0x5b   :  { %563 = vcosq.f32 %v154_v38  ;;  %v248_v53 = vor.u32 4788187, %v247_v50  ;;  %v251_v54 = vcvt.s32.f32 %v244_v49  ;;  %vm476_vm3 = vcmp.lt.s32.totalorder %v475_v32, 2 }
  0x5c   :  { %565 = vsinq.f32 %v154_v38 }
  0x5d   :  { %v249_v58 = vand.u32 2147483647, %v248_v53  ;;  %567 = vrsqrt.f32 %v734_v52 }
  0x5f   :  { %v252_v0 = vmul.f32 %v251_v54, %v249_v58 }
  0x61   :  { %v253_v6 = vxor.u32 2147483648, %v252_v0 }
  0x63   :  { %v254_v16 = vsel %vm171_vm2, %v253_v6, %v252_v0  ;;  %vm263_vm2 = vcmp.lt.s32.totalorder %v262_v31, 2 }
  0x64   :  { %v257_v13 = vsel %vm743_vm1, %v670_v10, %v254_v16  ;;  %vm477_vm1 = vcmp.eq.s32.totalorder %v475_v32, 0 }
  0x65   :  { %v564_v1 = vpop.eup %563  ;;  %569 = vcosq.f32 %v257_v13 }
  0x66   :  { %v566_v4 = vpop.eup %565  ;;  %v165_v59 = vxor.u32 2147483648, %v564_v1  ;;  %571 = vsinq.f32 %v257_v13 }
  0x67   :  { %v162_v9 = vxor.u32 2147483648, %v566_v4  ;;  %v568_v5 = vpop.eup %567 }
  0x68   :  { %v166_v12 = vsel %vm164_vm5, %v165_v59, %v566_v4  ;;  %v378_v15 = vsel %vm376_vm6, %v165_v59, %v566_v4  ;;  %v58_v33 = vmul.f32 %v568_v5, %v734_v52  ;;  %vm503_vm5 = vcmask 254080  }
  0x69   :  { %v163_v17 = vsel %vm161_vm4, %v564_v1, %v162_v9  ;;  %v375_v18 = vsel %vm373_vm7, %v564_v1, %v162_v9  ;;  %vm261_vm4 = vweird.f32 %v670_v10 }
  0x6a   :  { %v167_v20 = vsel %vm160_vm9, %v163_v17, %v166_v12  ;;  %v379_v21 = vsel %vm372_vm10, %v375_v18, %v378_v15  ;;  %v60_v27 = vsel %vm59_vm12, %v734_v52, %v58_v33 }
  0x6b   :  { %v168_v24 = vsel %vm158_vm8, nan, %v167_v20  ;;  %v380_v26 = vsel %vm158_vm8, nan, %v379_v21  ;;  %v63_v40 = vsel %vm61_vm13, %v62_v7, %v60_v27 }
  0x6c   :  { %v485_v28 = vmul.f32 %v380_v26, %v56_v11  ;;  %v272_v29 = vmul.f32 %v168_v24, %v56_v11 }
  0x6e   :  { %v492_v30 = vrot.slane %v485_v28, %v491_v22  ;;  %275 = vst.msk [vmem:[#allocation5] sm:$0x1] %vm274_vm11, %v272_v29 }
  0x6f   :  { %v570_v35 = vpop.eup %569 }
  0x70   :  { %497 = vrot.lane.b32.xlu0 %v492_v30, %s622_s19  ;;  %v572_v25 = vpop.eup %571  ;;  %v268_v36 = vxor.u32 2147483648, %v570_v35 }
  0x71   :  { %v265_v34 = vxor.u32 2147483648, %v572_v25 }
  0x72   :  { %v269_v37 = vsel %vm267_vm14, %v268_v36, %v572_v25  ;;  %v482_v39 = vsel %vm480_vm15, %v268_v36, %v572_v25 }
  0x73   :  { %v266_v42 = vsel %vm264_vm0, %v570_v35, %v265_v34  ;;  %v479_v23 = vsel %vm477_vm1, %v570_v35, %v265_v34 }
  0x74   :  { %v270_v38 = vsel %vm263_vm2, %v266_v42, %v269_v37  ;;  %v483_v43 = vsel %vm476_vm3, %v479_v23, %v482_v39 }
  0x75   :  { %v271_v44 = vsel %vm261_vm4, nan, %v270_v38  ;;  %v484_v45 = vsel %vm261_vm4, nan, %v483_v43 }
  0x76   :  { %v273_v41 = vmul.f32 %v271_v44, %v63_v40  ;;  %v486_v46 = vmul.f32 %v484_v45, %v63_v40 }
  0x78   :  { %v496_v47 = vrot.slane %v486_v46, %v491_v22  ;;  %276 = vst.msk [vmem:[#allocation5 + $0x1] sm:$0x1] %vm274_vm11, %v273_v41 }
  0x7a   :  { %499 = vrot.lane.b32.xlu0 %v496_v47, %s622_s19 }
  0xe2   :  { %v498_v48 = vpop.permute.xlu0 %497 }
  0xe3   :  { %504 = vst.msk [vmem:[#allocation5] sm:$0x1] %vm503_vm5, %v498_v48 }
  0xec   :  { %v500_v10 = vpop.permute.xlu0 %499 }
  0xed   :  { %505 = vst.msk [vmem:[#allocation5 + $0x1] sm:$0x1] %vm503_vm5, %v500_v10 }
  0xee   :  { %606 = shalt.err (!%p603_p12)
}
  0xef   :  { %s607_s30 = scalar_lea.hbm %s798_s2, 32 }
  0xf0   :  { %p608_p13 = scmp.ne.s32.totalorder %s798_s2, %s607_s30  ;;  %p611_p0 = scmp.lt.u32.totalorder %s607_s30, %s798_s2 }
  0xf2   :  { %p613_p1 = pnand %p611_p0, %p608_p13 }
  0xf4   :  { %616 = shalt.err (!%p613_p1)
}
  0xf5   :  { %517 = dma.vmem_to_hbm [thread:$0]  %s512_s1, 32, %s798_s2, [#allocation4], %s622_s19, %s622_s19, %s623_s20  }
  0xf6   :  { %619 = dma.done.wait [#allocation4], 32  }
  0xf7   :  { %620 = vsyncadd [#allocation4], 4294967264 }
  0xf8   :  { %521 = vsyncpa [#allocation3], 1 }
  0xf9   :  { %522 = vsyncpa [#allocation4], 1 }

</bundles_post_ra>
